<compile_context>
chip_gen: v6e
topology: v6e:2x2x1
jax: 0.10.0
libtpu: 0.0.40
codegen_flags: <defaults>
</compile_context>

<pallas_src>
import math

import jax
import jax.numpy as jnp
import numpy as np
from jax.experimental import pallas as pl
from jax.experimental.pallas import tpu as pltpu


def _fused_embedding_kernel(feat_ref, w_ref, bias_ref, out_ref):
    # feat_ref: (BB, T, K_pad)  [x_prev | x | x_next | temporal | one_hot | 0pad]
    # w_ref:    (K_pad, D)      [w_conv(k,c) rows ; w_temp ; emb_table ; 0pad]
    # bias_ref: (T, D)          pos_emb + conv bias + linear bias
    # out_ref:  (BB, T, D)
    BB, T, K = feat_ref.shape
    D = out_ref.shape[-1]

    # Flatten (BB, T) -> rows; T is a multiple of 8 so this is a layout no-op.
    feat = feat_ref[...].reshape(BB * T, K)
    acc = jnp.dot(feat, w_ref[...],
                  preferred_element_type=jnp.float32,
                  precision=jax.lax.Precision.HIGHEST)
    acc = acc.reshape(BB, T, D) + bias_ref[...][None, :, :]
    out_ref[...] = acc.astype(out_ref.dtype)


def _round_up(n, m):
    return ((n + m - 1) // m) * m


def _min_grid_steps():
    """>=2 grid steps on 2-TensorCore (v7x-class) parts, 1 elsewhere."""
    try:
        kind = jax.devices()[0].device_kind.lower()
    except Exception:
        return 1
    return 2 if ("v7" in kind or "7x" in kind) else 1


def _choose_block_batch(B, T, K_pad, D, *, budget_bytes=40 << 20, min_steps=1):
    """Largest divisor BB of B whose resident VMEM estimate fits the budget."""
    # Per batch row (f32): double-buffered feature input + double-buffered
    # output + one matmul-result temporary.
    bytes_per_row = 4 * T * (2 * K_pad + 2 * D + D)
    # Grid-invariant operands (fused weight + bias table), double-buffered.
    const_bytes = 4 * 2 * (K_pad * D + T * D)
    avail = max(budget_bytes - const_bytes, bytes_per_row)
    cap = max(1, avail // bytes_per_row)
    if min_steps > 1:
        cap = min(cap, max(1, B // min_steps))
    bb = 1
    for d in range(1, B + 1):
        if B % d == 0 and d <= cap:
            bb = d
    return bb


def custom_embedding(x, x_mark, w_conv, b_conv, w_temp, b_temp, emb_table,
                     pos_pe, *, block_batch=None):
    B, T, c_in = x.shape
    temporal_size = x_mark.shape[-1] - 1
    seq_num, D = emb_table.shape

    K = 3 * c_in + temporal_size + seq_num
    K_pad = _round_up(K, 32)

    # ---- host-side feature slab (cheap layout work, done once) -------------
    x_prev = jnp.roll(x, 1, axis=1)          # circular tap t-1
    x_next = jnp.roll(x, -1, axis=1)         # circular tap t+1
    temporal = x_mark[:, :, :temporal_size]
    ids = x_mark[:, :, -1].astype(jnp.int32)  # matches .long() for int-valued f32
    one_hot = (ids[:, :, None] == jnp.arange(seq_num, dtype=jnp.int32)
               ).astype(jnp.float32)
    feat = jnp.concatenate([x_prev, x, x_next, temporal, one_hot], axis=-1)
    if K_pad > K:
        feat = jnp.concatenate(
            [feat, jnp.zeros((B, T, K_pad - K), jnp.float32)], axis=-1)

    # ---- fused (K_pad, D) weight and (T, D) additive table ------------------
    w_fused = jnp.concatenate(
        [w_conv.reshape(3 * c_in, D), w_temp, emb_table], axis=0)
    if K_pad > K:
        w_fused = jnp.concatenate(
            [w_fused, jnp.zeros((K_pad - K, D), jnp.float32)], axis=0)
    bias = (pos_pe + b_conv[None, :] + b_temp[None, :]).astype(jnp.float32)

    BB = block_batch if block_batch is not None else _choose_block_batch(
        B, T, K_pad, D, min_steps=_min_grid_steps())
    grid = (B // BB,)

    cost = pl.CostEstimate(
        flops=2 * B * T * K_pad * D,
        transcendentals=0,
        bytes_accessed=4 * (B * T * K_pad + K_pad * D + T * D + B * T * D))

    return pl.pallas_call(
        _fused_embedding_kernel,
        out_shape=jax.ShapeDtypeStruct((B, T, D), jnp.float32),
        grid=grid,
        in_specs=[
            pl.BlockSpec((BB, T, K_pad), lambda b: (b, 0, 0)),
            pl.BlockSpec((K_pad, D), lambda b: (0, 0)),
            pl.BlockSpec((T, D), lambda b: (0, 0)),
        ],
        out_specs=pl.BlockSpec((BB, T, D), lambda b: (b, 0, 0)),
        compiler_params=pltpu.CompilerParams(
            dimension_semantics=("parallel",),
            vmem_limit_bytes=48 << 20),
        cost_estimate=cost,
    )(feat, w_fused, bias)


def positional_embedding_table(T, d_model):
    """Replica of PositionalEmbedding.pe[0, :T] (sin on even, cos on odd)."""
    pe = np.zeros((T, d_model), np.float32)
    position = np.arange(T, dtype=np.float32)[:, None]
    div_term = np.exp(np.arange(0, d_model, 2, dtype=np.float32)
                      * -(math.log(10000.0) / d_model))
    pe[:, 0::2] = np.sin(position * div_term)
    pe[:, 1::2] = np.cos(position * div_term)[:, :d_model // 2]
    return jnp.asarray(pe)


def reference(x, x_mark, w_conv, b_conv, w_temp, b_temp, emb_table, pos_pe):
    """Plain-JAX replica of CustomEmbedding.forward (dropout = identity)."""
    hp = jax.lax.Precision.HIGHEST
    temporal_size = x_mark.shape[-1] - 1
    x_prev = jnp.roll(x, 1, axis=1)
    x_next = jnp.roll(x, -1, axis=1)
    val = (jnp.einsum('btc,cd->btd', x_prev, w_conv[0], precision=hp)
           + jnp.einsum('btc,cd->btd', x, w_conv[1], precision=hp)
           + jnp.einsum('btc,cd->btd', x_next, w_conv[2], precision=hp)
           + b_conv)
    temp = jnp.einsum('btf,fd->btd', x_mark[:, :, :temporal_size], w_temp,
                      precision=hp) + b_temp
    ids = x_mark[:, :, -1].astype(jnp.int32)
    seq = emb_table[ids]
    return val + temp + seq + pos_pe[None]


def init_params(key, c_in, d_model, temporal_size, seq_num):
    """Deterministic PyTorch-init-shaped synthetic parameters."""
    k1, k2, k3, k4, k5 = jax.random.split(key, 5)
    # Conv1d(c_in, d_model, 3): kaiming_normal_ (fan_in = 3*c_in).
    std = math.sqrt(2.0 / (3 * c_in))
    w_conv = std * jax.random.normal(k1, (3, c_in, d_model), jnp.float32)
    bound = 1.0 / math.sqrt(3 * c_in)
    b_conv = jax.random.uniform(k2, (d_model,), jnp.float32, -bound, bound)
    # Linear(temporal_size, d_model): uniform(+-1/sqrt(in)); stored (in, out).
    lb = 1.0 / math.sqrt(temporal_size)
    w_temp = jax.random.uniform(k3, (temporal_size, d_model), jnp.float32, -lb, lb)
    b_temp = jax.random.uniform(k4, (d_model,), jnp.float32, -lb, lb)
    # Embedding(seq_num, d_model): N(0, 1).
    emb_table = jax.random.normal(k5, (seq_num, d_model), jnp.float32)
    return w_conv, b_conv, w_temp, b_temp, emb_table


if __name__ == "__main__":
    B, T = 4, 16              # batch, sequence length (T multiple of 8)
    c_in = 4                  # series channels fed to TokenEmbedding
    d_model = 128             # lane-dense output (multiple of 128)
    temporal_size = 5         # temporal covariates (x_mark[..., :-1])
    seq_num = 4               # number of sequence ids

    key = jax.random.PRNGKey(0)
    kx, kt, ks, kp = jax.random.split(key, 4)
    x = jax.random.normal(kx, (B, T, c_in), jnp.float32)
    temporal = jax.random.normal(kt, (B, T, temporal_size), jnp.float32)
    seq_ids = jax.random.randint(ks, (B, T, 1), 0, seq_num).astype(jnp.float32)
    x_mark = jnp.concatenate([temporal, seq_ids], axis=-1)

    w_conv, b_conv, w_temp, b_temp, emb_table = init_params(
        kp, c_in, d_model, temporal_size, seq_num)
    pos_pe = positional_embedding_table(T, d_model)

    out = custom_embedding(x, x_mark, w_conv, b_conv, w_temp, b_temp,
                           emb_table, pos_pe)
    out = jax.block_until_ready(out)

    ref = reference(x, x_mark, w_conv, b_conv, w_temp, b_temp, emb_table,
                    pos_pe)
    np.testing.assert_allclose(np.asarray(out), np.asarray(ref),
                               rtol=2e-5, atol=2e-5)
    print("KERNEL_OK")
</pallas_src>

<mosaic_0001>
module attributes {stable_mosaic.version = 11 : i64} {
  func.func @_fused_embedding_kernel(%arg0: i32, %arg1: memref<4x16x32xf32, #tpu.memory_space<vmem>>, %arg2: memref<32x128xf32, #tpu.memory_space<vmem>>, %arg3: memref<16x128xf32, #tpu.memory_space<vmem>>, %arg4: memref<4x16x128xf32, #tpu.memory_space<vmem>>) attributes {dimension_semantics = [#tpu.dimension_semantics<parallel>], iteration_bounds = array<i64: 1>, scalar_prefetch = 0 : i64, scratch_operands = 0 : i64, tpu.core_type = #tpu.core_type<tc>, window_params = [{transform_indices = @transform_0, window_bounds = array<i64: 4, 16, 32>}, {pipeline_mode = #tpu.pipeline_mode<synchronous>, transform_indices = @transform_1, window_bounds = array<i64: 32, 128>}, {pipeline_mode = #tpu.pipeline_mode<synchronous>, transform_indices = @transform_2, window_bounds = array<i64: 16, 128>}, {transform_indices = @transform_3, window_bounds = array<i64: 4, 16, 128>}]} {
    %c0 = arith.constant 0 : index
    %c0_0 = arith.constant 0 : index
    %c0_1 = arith.constant 0 : index
    %0 = vector.load %arg1[%c0, %c0_0, %c0_1] : memref<4x16x32xf32, #tpu.memory_space<vmem>>, vector<4x16x32xf32>
    %1 = vector.shape_cast %0 : vector<4x16x32xf32> to vector<64x32xf32>
    %c0_2 = arith.constant 0 : index
    %c0_3 = arith.constant 0 : index
    %2 = vector.load %arg2[%c0_2, %c0_3] : memref<32x128xf32, #tpu.memory_space<vmem>>, vector<32x128xf32>
    %cst = arith.constant dense<0.000000e+00> : vector<64x128xf32>
    %3 = tpu.matmul %1, %2, %cst {dimension_numbers = #tpu.dot_dimension_numbers<[1], [0], [0], [1], [0, 0, 1, 1], [], []>, precision = #tpu.contract_precision<fp32>} : vector<64x32xf32>, vector<32x128xf32>, vector<64x128xf32> -> vector<64x128xf32>
    %4 = vector.shape_cast %3 : vector<64x128xf32> to vector<4x16x128xf32>
    %c0_4 = arith.constant 0 : index
    %c0_5 = arith.constant 0 : index
    %5 = vector.load %arg3[%c0_4, %c0_5] : memref<16x128xf32, #tpu.memory_space<vmem>>, vector<16x128xf32>
    %6 = vector.shape_cast %5 : vector<16x128xf32> to vector<1x16x128xf32>
    %7 = vector.broadcast %6 : vector<1x16x128xf32> to vector<4x16x128xf32>
    %8 = arith.addf %4, %7 : vector<4x16x128xf32>
    %c0_6 = arith.constant 0 : index
    %c0_7 = arith.constant 0 : index
    %c0_8 = arith.constant 0 : index
    %9 = vector.load %arg4[%c0_6, %c0_7, %c0_8] : memref<4x16x128xf32, #tpu.memory_space<vmem>>, vector<4x16x128xf32>
    tpu.vector_store %arg4[%c0_6, %c0_7, %c0_8], %8 {strides = array<i32>} : memref<4x16x128xf32, #tpu.memory_space<vmem>>, vector<4x16x128xf32>,
    return
  }
  func.func @transform_0(%arg0: i32) -> (i32, i32, i32) {
    %c0_i32 = arith.constant 0 : i32
    %c0_i32_0 = arith.constant 0 : i32
    %c0_i32_1 = arith.constant 0 : i32
    return %arg0, %c0_i32, %c0_i32_0 : i32, i32, i32
  }
  func.func @transform_1(%arg0: i32) -> (i32, i32) {
    %c0_i32 = arith.constant 0 : i32
    %c0_i32_0 = arith.constant 0 : i32
    %c0_i32_1 = arith.constant 0 : i32
    return %c0_i32, %c0_i32_0 : i32, i32
  }
  func.func @transform_2(%arg0: i32) -> (i32, i32) {
    %c0_i32 = arith.constant 0 : i32
    %c0_i32_0 = arith.constant 0 : i32
    %c0_i32_1 = arith.constant 0 : i32
    return %c0_i32, %c0_i32_0 : i32, i32
  }
  func.func @transform_3(%arg0: i32) -> (i32, i32, i32) {
    %c0_i32 = arith.constant 0 : i32
    %c0_i32_0 = arith.constant 0 : i32
    %c0_i32_1 = arith.constant 0 : i32
    return %arg0, %c0_i32, %c0_i32_0 : i32, i32, i32
  }
}

</mosaic_0001>

<bundles_post_ra>
// kernel: tpu_custom_call.1
= control target key start
LH: loop header
LB: loop body
LE: loop exit
PB: predicated region body
PF: predicated region fallthrough
CT: control target
= control target key end

     0   :  { %8 = vsyncpa [#allocation3], 0  ;;  %s1445_s0 = inlined_call_operand.hbm [shape: f32[4,16,32], index: 0, kind: input, shape index: {}]   ;;  %s1446_s1 = inlined_call_operand.hbm [shape: f32[32,128], index: 1, kind: input, shape index: {}]   ;;  %s1447_s2 = inlined_call_operand.hbm [shape: f32[16,128], index: 2, kind: input, shape index: {}]   ;;  %s1448_s3 = inlined_call_operand.hbm [shape: f32[4,16,128], index: 3, kind: output, shape index: {}]  }
   0x1   :  { %9 = vsyncpa [#allocation6], 0 }
   0x2   :  { %10 = vsyncpa [#allocation4], 0  ;;  %s1199_s12 = smov [#allocation5]   ;;  %s1200_s14 = smov [#allocation2]  }
   0x3   :  { %s28_s13 = sshll.u32 %s1199_s12, 4  ;;  %s16_s15 = sshll.u32 %s1200_s14, 4  ;;  %s29_s13 = int_to_ptr.vmem [resolvable:$true] %s28_s13  ;;  %s17_s15 = int_to_ptr.vmem [resolvable:$true] %s16_s15 }
   0x4   :  { %s1121_s16 = scalar_lea.vmem %s29_s13, 512  ;;  %p1126_p1 = scmp.lt.s32.totalorder %s29_s13, %s29_s13 }
   0x5   :  { %p1122_p0 = scmp.ne.s32.totalorder %s29_s13, %s1121_s16  ;;  %p1127_p2 = scmp.lt.s32.totalorder %s1121_s16, %s1121_s16 }
   0x7   :  { %p1128_p3 = por %p1127_p2, %p1126_p1 }
   0x9   :  { %p1129_p4 = pnand %p1128_p3, %p1122_p0 }
   0xb   :  { %1132 = shalt.err (!%p1129_p4)
}
   0xc   :  { %s1201_s17 = smov 128   ;;  %s1202_s18 = smov 8  }
   0xd   :  { %34 = dma.hbm_to_vmem [thread:$0]  %s1446_s1, 512, %s29_s13, [#allocation6], %s1201_s17, %s1201_s17, %s1202_s18  }
   0xe   :  { %s1141_s21 = scalar_lea.vmem %s17_s15, 1024  ;;  %p1146_p6 = scmp.lt.s32.totalorder %s17_s15, %s17_s15 }
   0xf   :  { %p1142_p5 = scmp.ne.s32.totalorder %s17_s15, %s1141_s21  ;;  %p1147_p7 = scmp.lt.s32.totalorder %s1141_s21, %s1141_s21 }
  0x11   :  { %p1148_p8 = por %p1147_p7, %p1146_p6 }
  0x13   :  { %p1149_p9 = pnand %p1148_p8, %p1142_p5 }
  0x15   :  { %1152 = shalt.err (!%p1149_p9)
}
  0x16   :  { %22 = dma.hbm_to_vmem [thread:$0]  %s1445_s0, 1024, %s17_s15, [#allocation3], %s1201_s17, %s1201_s17, %s1202_s18  }
  0x17   :  { %s1203_s24 = smov [#allocation7]  }
  0x18   :  { %s40_s25 = sshll.u32 %s1203_s24, 4  ;;  %s41_s25 = int_to_ptr.vmem [resolvable:$true] %s40_s25 }
  0x19   :  { %s1161_s26 = scalar_lea.vmem %s41_s25, 256  ;;  %p1166_p11 = scmp.lt.s32.totalorder %s41_s25, %s41_s25 }
  0x1a   :  { %p1162_p10 = scmp.ne.s32.totalorder %s41_s25, %s1161_s26  ;;  %p1167_p12 = scmp.lt.s32.totalorder %s1161_s26, %s1161_s26 }
  0x1c   :  { %p1168_p13 = por %p1167_p12, %p1166_p11 }
  0x1e   :  { %p1169_p0 = pnand %p1168_p13, %p1162_p10 }
  0x20   :  { %1172 = shalt.err (!%p1169_p0)
}
  0x21   :  { %46 = dma.hbm_to_vmem [thread:$0]  %s1447_s2, 256, %s41_s25, [#allocation6], %s1201_s17, %s1201_s17, %s1202_s18  }
  0x22   :  { %1193 = dma.done.wait [#allocation3], 1024  }
  0x23   :  { %1194 = vsyncadd [#allocation3], 4294966272 }
  0x24   :  { %1195 = dma.done.wait [#allocation6], 768  }
  0x25   :  { %1196 = vsyncadd [#allocation6], 4294966528  ;;  %vm68_vm0 = vcmask 261120   ;;  %v67_v0 = vld [vmem:[#allocation5 + $0x18] sm:$0xff]  ;;  %v66_v1 = vld [vmem:[#allocation5 + $0x10] sm:$0xff]  ;;  %s1204_s0 = smov [#allocation8]  }
  0x26   :  { %v65_v2 = vld [vmem:[#allocation5 + $0x8] sm:$0xff]  ;;  %v1243_v3 = vand.u32 4294901760, %v67_v0  ;;  %v1245_v4 = vand.u32 4294901760, %v66_v1  ;;  %v64_v6 = vld [vmem:[#allocation5] sm:$0xff]  ;;  %v58_v12 = vld [vmem:[#allocation2 + $0x10] sm:$0xff]  ;;  %s902_s2 = sshll.u32 %s1204_s0, 4  ;;  %s903_s2 = int_to_ptr.vmem [resolvable:$true] %s902_s2 }
  0x27   :  { %v1247_v5 = vand.u32 4294901760, %v65_v2  ;;  %v56_v7 = vld [vmem:[#allocation2] sm:$0xff]  ;;  %v57_v8 = vld [vmem:[#allocation2 + $0x8] sm:$0xff]  ;;  %v1249_v9 = vand.u32 4294901760, %v64_v6  ;;  %v59_v13 = vld [vmem:[#allocation2 + $0x18] sm:$0xff]  ;;  %v76_v19 = vsel %vm68_vm0, %v58_v12, 0  ;;  %p1178_p2 = scmp.lt.s32.totalorder %s903_s2, %s903_s2 }
  0x28   :  { %v70_v10 = vsel %vm68_vm0, %v56_v7, 0  ;;  %v73_v11 = vsel %vm68_vm0, %v57_v8, 0  ;;  %987 = vmatprep.subr.mxu0 %v1243_v3  ;;  %v1255_v14 = vsub.f32 %v67_v0, %v1243_v3  ;;  %v1262_v17 = vsub.f32 %v66_v1, %v1245_v4  ;;  %v60_v38 = vld [vmem:[#allocation2 + $0x20] sm:$0xff]  ;;  %v61_v39 = vld [vmem:[#allocation2 + $0x28] sm:$0xff]  ;;  %v62_v47 = vld [vmem:[#allocation2 + $0x30] sm:$0xff]  ;;  %s1173_s28 = scalar_lea.vmem %s903_s2, 1024 }
  0x29   :  { %v1257_v15 = vand.u32 4294901760, %v70_v10  ;;  %v1259_v16 = vand.u32 4294901760, %v73_v11  ;;  %988 = vmatpush3.msra.mxu0 %v1243_v3  ;;  %v1266_v18 = vsub.f32 %v65_v2, %v1247_v5  ;;  %v79_v20 = vsel %vm68_vm0, %v59_v13, 0  ;;  %v63_v48 = vld [vmem:[#allocation2 + $0x38] sm:$0xff]  ;;  %p1174_p1 = scmp.ne.s32.totalorder %s903_s2, %s1173_s28  ;;  %p1179_p3 = scmp.lt.s32.totalorder %s1173_s28, %s1173_s28 }
  0x2a   :  { %v1271_v21 = vsub.f32 %v64_v6, %v1249_v9  ;;  %989 = vmatprep.subr.mxu0 %v1245_v4  ;;  %v1275_v22 = vand.u32 4294901760, %v1255_v14  ;;  %v1284_v25 = vand.u32 4294901760, %v1262_v17  ;;  %v1291_v27 = vand.u32 4294901760, %v76_v19 }
  0x2b   :  { %v1278_v23 = vsub.f32 %v70_v10, %v1257_v15  ;;  %v1281_v24 = vsub.f32 %v73_v11, %v1259_v16  ;;  %1015 = vmatprep.mubr.f32.mxu1 %v1257_v15  ;;  %990 = vmatpush3.msra.mxu0 %v1245_v4  ;;  %v1289_v26 = vand.u32 4294901760, %v1266_v18  ;;  %v1293_v28 = vand.u32 4294901760, %v79_v20  ;;  %p1180_p4 = por %p1179_p3, %p1178_p2 }
  0x2c   :  { %v1296_v29 = vand.u32 4294901760, %v1271_v21  ;;  %991 = vmatprep.subr.mxu0 %v1247_v5  ;;  %v270_v30 = vsub.f32 %v1255_v14, %v1275_v22  ;;  %v277_v33 = vsub.f32 %v1262_v17, %v1284_v25  ;;  %v1309_v35 = vsub.f32 %v76_v19, %v1291_v27 }
  0x2d   :  { %v164_v31 = vand.u32 4294901760, %v1278_v23  ;;  %v174_v32 = vand.u32 4294901760, %v1281_v24  ;;  %992 = vmatpush3.msra.mxu0 %v1247_v5  ;;  %v284_v34 = vsub.f32 %v1266_v18, %v1289_v26  ;;  %v1312_v36 = vsub.f32 %v79_v20, %v1293_v28  ;;  %p1181_p5 = pnand %p1180_p4, %p1174_p1 }
  0x2e   :  { %v291_v37 = vsub.f32 %v1271_v21, %v1296_v29  ;;  %993 = vmatprep.subr.mxu0 %v1249_v9  ;;  %v271_v40 = vand.u32 4294901760, %v270_v30  ;;  %v278_v43 = vand.u32 4294901760, %v277_v33  ;;  %v184_v45 = vand.u32 4294901760, %v1309_v35 }
  0x2f   :  { %v165_v41 = vsub.f32 %v1278_v23, %v164_v31  ;;  %v175_v42 = vsub.f32 %v1281_v24, %v174_v32  ;;  %994 = vmatpush3.msra.mxu0 %v1249_v9  ;;  %v285_v44 = vand.u32 4294901760, %v284_v34  ;;  %v194_v46 = vand.u32 4294901760, %v1312_v36 }
  0x30   :  { %1007 = vmatprep.subr.mxu1 %v271_v40  ;;  %1027 = vmatprep.subr.mxu0 %v1255_v14  ;;  %v82_v51 = vsel %vm68_vm0, %v60_v38, 0  ;;  %v85_v52 = vsel %vm68_vm0, %v61_v39, 0  ;;  %v185_v53 = vsub.f32 %v1309_v35, %v184_v45  ;;  %v292_v57 = vand.u32 4294901760, %v291_v37 }
  0x31   :  { %v166_v49 = vand.u32 4294901760, %v165_v41  ;;  %v176_v50 = vand.u32 4294901760, %v175_v42  ;;  %1008 = vmatpush3.msra.mxu1 %v271_v40  ;;  %v195_v54 = vsub.f32 %v1312_v36, %v194_v46  ;;  %v1335_v55 = vand.u32 4294901760, %v82_v51 }
  0x32   :  { %v1337_v56 = vand.u32 4294901760, %v85_v52  ;;  %1009 = vmatprep.subr.mxu1 %v278_v43  ;;  %v88_v58 = vsel %vm68_vm0, %v62_v47, 0  ;;  %v91_v59 = vsel %vm68_vm0, %v63_v48, 0  ;;  %v186_v60 = vand.u32 4294901760, %v185_v53 }
  0x33   :  { %995 = vmatprep.mubr.f32.mxu0 %v166_v49  ;;  %1010 = vmatpush3.msra.mxu1 %v278_v43  ;;  %v196_v61 = vand.u32 4294901760, %v195_v54  ;;  %v1342_v62 = vsub.f32 %v82_v51, %v1335_v55  ;;  %v1348_v0 = vand.u32 4294901760, %v88_v58  ;;  %v1350_v1 = vand.u32 4294901760, %v91_v59 }
  0x34   :  { %996 = vmatmul.mubr.f32.vlgmr.msra.gmra.mxu0 %v176_v50  ;;  %v1345_v63 = vsub.f32 %v85_v52, %v1337_v56  ;;  %1011 = vmatprep.subr.mxu1 %v285_v44 }
  0x35   :  { %1028 = vmatpush3.msra.mxu0 %v1255_v14  ;;  %998 = vmatprep.mubr.f32.mxu0 %v186_v60  ;;  %v204_v2 = vand.u32 4294901760, %v1342_v62  ;;  %v1356_v7 = vsub.f32 %v88_v58, %v1348_v0  ;;  %v1359_v8 = vsub.f32 %v91_v59, %v1350_v1 }
  0x36   :  { %1012 = vmatpush3.msra.mxu1 %v285_v44  ;;  %v214_v6 = vand.u32 4294901760, %v1345_v63  ;;  %1029 = vmatprep.subr.mxu0 %v1262_v17 }
  0x37   :  { %1013 = vmatprep.subr.mxu1 %v292_v57  ;;  %v205_v10 = vsub.f32 %v1342_v62, %v204_v2  ;;  %v224_v12 = vand.u32 4294901760, %v1356_v7  ;;  %v234_v13 = vand.u32 4294901760, %v1359_v8  ;;  %1030 = vmatpush3.msra.mxu0 %v1262_v17 }
  0x38   :  { %999 = vmatmul.mubr.f32.gmra.mxu0 %v196_v61  ;;  %1014 = vmatpush3.msra.mxu1 %v292_v57  ;;  %v215_v11 = vsub.f32 %v1345_v63, %v214_v6 }
  0x39   :  { %1016 = vmatmul.mubr.f32.vlgmr.msra.gmra.mxu1 %v1259_v16  ;;  %1047 = vmatprep.subr.mxu1 %v1243_v3  ;;  %v206_v14 = vand.u32 4294901760, %v205_v10  ;;  %v225_v20 = vsub.f32 %v1356_v7, %v224_v12  ;;  %v235_v30 = vsub.f32 %v1359_v8, %v234_v13 }
  0x3a   :  { %1048 = vmatpush3.msra.mxu1 %v1243_v3  ;;  %v216_v19 = vand.u32 4294901760, %v215_v11  ;;  %1018 = vmatprep.mubr.f32.mxu1 %v1291_v27 }
  0x3b   :  { %1049 = vmatprep.subr.mxu1 %v1245_v4  ;;  %1001 = vmatprep.mubr.f32.mxu0 %v206_v14  ;;  %v226_v33 = vand.u32 4294901760, %v225_v20  ;;  %v236_v34 = vand.u32 4294901760, %v235_v30 }
  0x3c   :  { %1050 = vmatpush3.msra.mxu1 %v1245_v4  ;;  %1002 = vmatmul.mubr.f32.gmra.mxu0 %v216_v19 }
  0x3d   :  { %1019 = vmatmul.mubr.f32.gmra.mxu1 %v1293_v28  ;;  %1031 = vmatprep.subr.mxu0 %v1266_v18 }
  0x3e   :  { %1021 = vmatprep.mubr.f32.mxu1 %v1335_v55  ;;  %1004 = vmatprep.mubr.f32.mxu0 %v226_v33 }
  0x3f   :  { %1032 = vmatpush3.msra.mxu0 %v1266_v18  ;;  %1051 = vmatprep.subr.mxu1 %v1247_v5 }
  0x40   :  { %1033 = vmatprep.subr.mxu0 %v1271_v21  ;;  %1005 = vmatmul.mubr.f32.gmra.mxu0 %v236_v34 }
  0x41   :  { %1022 = vmatmul.mubr.f32.gmra.mxu1 %v1337_v56  ;;  %1034 = vmatpush3.msra.mxu0 %v1271_v21 }
  0x42   :  { %1035 = vmatprep.mubr.f32.mxu0 %v1278_v23  ;;  %1052 = vmatpush3.msra.mxu1 %v1247_v5 }
  0x43   :  { %1024 = vmatprep.mubr.f32.mxu1 %v1348_v0  ;;  %1053 = vmatprep.subr.mxu1 %v1249_v9 }
  0x44   :  { %1067 = vmatprep.subr.mxu0 %v1275_v22  ;;  %1036 = vmatmul.mubr.f32.vlgmr.msra.gmra.mxu0 %v1281_v24 }
  0x45   :  { %1025 = vmatmul.mubr.f32.gmra.mxu1 %v1350_v1  ;;  %1038 = vmatprep.mubr.f32.mxu0 %v1309_v35 }
  0x46   :  { %1054 = vmatpush3.msra.mxu1 %v1249_v9  ;;  %1055 = vmatprep.mubr.f32.mxu1 %v164_v31 }
  0x47   :  { %1068 = vmatpush3.msra.mxu0 %v1275_v22  ;;  %1087 = vmatprep.subr.mxu1 %v1243_v3 }
  0x48   :  { %1069 = vmatprep.subr.mxu0 %v1284_v25  ;;  %1039 = vmatmul.mubr.f32.gmra.mxu0 %v1312_v36 }
  0x49   :  { %1056 = vmatmul.mubr.f32.vlgmr.msra.gmra.mxu1 %v174_v32  ;;  %1041 = vmatprep.mubr.f32.mxu0 %v1342_v62 }
  0x4a   :  { %1088 = vmatpush3.msra.mxu1 %v1243_v3  ;;  %1058 = vmatprep.mubr.f32.mxu1 %v184_v45 }
  0x4b   :  { %1070 = vmatpush3.msra.mxu0 %v1284_v25  ;;  %1089 = vmatprep.subr.mxu1 %v1245_v4 }
  0x4c   :  { %1071 = vmatprep.subr.mxu0 %v1289_v26  ;;  %1042 = vmatmul.mubr.f32.gmra.mxu0 %v1345_v63  ;;  %v880_v63 = vld [vmem:[#allocation7 + $0x8] sm:$0xff] }
  0x4d   :  { %1059 = vmatmul.mubr.f32.gmra.mxu1 %v194_v46  ;;  %1044 = vmatprep.mubr.f32.mxu0 %v1356_v7 }
  0x4e   :  { %1090 = vmatpush3.msra.mxu1 %v1245_v4  ;;  %1061 = vmatprep.mubr.f32.mxu1 %v204_v2 }
  0x4f   :  { %1072 = vmatpush3.msra.mxu0 %v1289_v26  ;;  %1091 = vmatprep.subr.mxu1 %v1247_v5 }
  0x50   :  { %1073 = vmatprep.subr.mxu0 %v1296_v29  ;;  %1045 = vmatmul.mubr.f32.gmra.mxu0 %v1359_v8 }
  0x51   :  { %1062 = vmatmul.mubr.f32.gmra.mxu1 %v214_v6  ;;  %1074 = vmatpush3.msra.mxu0 %v1296_v29 }
  0x52   :  { %1075 = vmatprep.mubr.f32.mxu0 %v1257_v15  ;;  %1092 = vmatpush3.msra.mxu1 %v1247_v5 }
  0x53   :  { %1064 = vmatprep.mubr.f32.mxu1 %v224_v12  ;;  %1093 = vmatprep.subr.mxu1 %v1249_v9  ;;  %v879_v12 = vld [vmem:[#allocation7] sm:$0xff] }
  0x54   :  { %1076 = vmatmul.mubr.f32.vlgmr.msra.gmra.mxu0 %v1259_v16  ;;  %1094 = vmatpush3.msra.mxu1 %v1249_v9 }
  0x55   :  { %1065 = vmatmul.mubr.f32.gmra.mxu1 %v234_v13  ;;  %1078 = vmatprep.mubr.f32.mxu0 %v1291_v27 }
  0x56   :  { %1095 = vmatprep.mubr.f32.mxu1 %v1257_v15 }
  0x58   :  { %1079 = vmatmul.mubr.f32.gmra.mxu0 %v1293_v28 }
  0x59   :  { %1096 = vmatmul.mubr.f32.vlgmr.msra.gmra.mxu1 %v1259_v16  ;;  %1081 = vmatprep.mubr.f32.mxu0 %v1335_v55 }
  0x5a   :  { %1098 = vmatprep.mubr.f32.mxu1 %v1291_v27 }
  0x5c   :  { %1082 = vmatmul.mubr.f32.gmra.mxu0 %v1337_v56 }
  0x5d   :  { %1099 = vmatmul.mubr.f32.gmra.mxu1 %v1293_v28  ;;  %1084 = vmatprep.mubr.f32.mxu0 %v1348_v0 }
  0x5e   :  { %1101 = vmatprep.mubr.f32.mxu1 %v1335_v55 }
  0x60   :  { %1085 = vmatmul.mubr.f32.gmra.mxu0 %v1350_v1 }
  0x61   :  { %1102 = vmatmul.mubr.f32.gmra.mxu1 %v1337_v56 }
  0x62   :  { %1104 = vmatprep.mubr.f32.mxu1 %v1348_v0 }
  0x65   :  { %1105 = vmatmul.mubr.f32.gmra.mxu1 %v1350_v1 }
  0xf4   :  { %v997_v3 = vpop.f32.mrf.mxu0 }
  0xf6   :  { %v168_v4 = vpop.f32.mrf.mxu0 }
  0xf8   :  { %v1000_v5 = vpop.f32.mrf.mxu0 }
  0xf9   :  { %v1017_v9 = vpop.f32.mrf.mxu1 }
  0xfa   :  { %v188_v15 = vpop.f32.mrf.mxu0  ;;  %v336_v44 = vadd.f32 %v1017_v9, %v997_v3 }
  0xfb   :  { %v329_v16 = vpop.f32.mrf.mxu1 }
  0xfc   :  { %v1003_v17 = vpop.f32.mrf.mxu0  ;;  %v330_v47 = vadd.f32 %v329_v16, %v168_v4 }
  0xfd   :  { %v1020_v18 = vpop.f32.mrf.mxu1 }
  0xfe   :  { %v208_v21 = vpop.f32.mrf.mxu0  ;;  %v348_v51 = vadd.f32 %v1020_v18, %v1000_v5 }
  0xff   :  { %v341_v22 = vpop.f32.mrf.mxu1 }
 0x100   :  { %v1006_v23 = vpop.f32.mrf.mxu0  ;;  %v342_v56 = vadd.f32 %v341_v22, %v188_v15 }
 0x101   :  { %v1023_v24 = vpop.f32.mrf.mxu1 }
 0x102   :  { %v228_v25 = vpop.f32.mrf.mxu0  ;;  %v360_v60 = vadd.f32 %v1023_v24, %v1003_v17 }
 0x103   :  { %v353_v26 = vpop.f32.mrf.mxu1 }
 0x104   :  { %v1037_v27 = vpop.f32.mrf.mxu0  ;;  %v354_v7 = vadd.f32 %v353_v26, %v208_v21 }
 0x105   :  { %v1026_v28 = vpop.f32.mrf.mxu1  ;;  %v459_v48 = vadd.f32 %v1037_v27, %v336_v44 }
 0x106   :  { %v451_v29 = vpop.f32.mrf.mxu0  ;;  %v372_v30 = vadd.f32 %v1026_v28, %v1006_v23 }
 0x107   :  { %v365_v31 = vpop.f32.mrf.mxu1  ;;  %v452_v52 = vadd.f32 %v451_v29, %v330_v47 }
 0x108   :  { %v1040_v32 = vpop.f32.mrf.mxu0  ;;  %v366_v16 = vadd.f32 %v365_v31, %v228_v25 }
 0x109   :  { %v1057_v35 = vpop.f32.mrf.mxu1  ;;  %v473_v57 = vadd.f32 %v1040_v32, %v348_v51 }
 0x10a   :  { %v465_v36 = vpop.f32.mrf.mxu0  ;;  %v586_v53 = vadd.f32 %v1057_v35, %v459_v48 }
 0x10b   :  { %v577_v37 = vpop.f32.mrf.mxu1  ;;  %v466_v0 = vadd.f32 %v465_v36, %v342_v56 }
 0x10c   :  { %v1043_v38 = vpop.f32.mrf.mxu0  ;;  %v578_v58 = vadd.f32 %v577_v37, %v452_v52 }
 0x10d   :  { %v1060_v39 = vpop.f32.mrf.mxu1  ;;  %v487_v8 = vadd.f32 %v1043_v38, %v360_v60 }
 0x10e   :  { %v479_v40 = vpop.f32.mrf.mxu0  ;;  %v602_v1 = vadd.f32 %v1060_v39, %v473_v57 }
 0x10f   :  { %v593_v41 = vpop.f32.mrf.mxu1  ;;  %v480_v33 = vadd.f32 %v479_v40, %v354_v7 }
 0x110   :  { %v1046_v42 = vpop.f32.mrf.mxu0  ;;  %v594_v13 = vadd.f32 %v593_v41, %v466_v0 }
 0x111   :  { %v1063_v43 = vpop.f32.mrf.mxu1  ;;  %v501_v17 = vadd.f32 %v1046_v42, %v372_v30 }
 0x112   :  { %v493_v45 = vpop.f32.mrf.mxu0  ;;  %v618_v4 = vadd.f32 %v1063_v43, %v487_v8 }
 0x113   :  { %v609_v46 = vpop.f32.mrf.mxu1  ;;  %v494_v29 = vadd.f32 %v493_v45, %v366_v16 }
 0x114   :  { %v1077_v49 = vpop.f32.mrf.mxu0  ;;  %v610_v22 = vadd.f32 %v609_v46, %v480_v33 }
 0x115   :  { %v1066_v50 = vpop.f32.mrf.mxu1  ;;  %v723_v59 = vadd.f32 %v1077_v49, %v586_v53 }
 0x116   :  { %v716_v54 = vpop.f32.mrf.mxu0  ;;  %v634_v28 = vadd.f32 %v1066_v50, %v501_v17 }
 0x117   :  { %v625_v55 = vpop.f32.mrf.mxu1  ;;  %v717_v2 = vadd.f32 %v716_v54, %v578_v58 }
 0x118   :  { %v1080_v61 = vpop.f32.mrf.mxu0  ;;  %v626_v40 = vadd.f32 %v625_v55, %v494_v29 }
 0x119   :  { %v1097_v62 = vpop.f32.mrf.mxu1  ;;  %v735_v14 = vadd.f32 %v1080_v61, %v602_v1 }
 0x11a   :  { %v840_v6 = vadd.f32 %v1097_v62, %v723_v59  ;;  %v728_v10 = vpop.f32.mrf.mxu0 }
 0x11b   :  { %v833_v11 = vpop.f32.mrf.mxu1  ;;  %v729_v5 = vadd.f32 %v728_v10, %v594_v13 }
 0x11c   :  { %v882_v19 = vadd.f32 %v880_v63, %v840_v6  ;;  %v834_v20 = vadd.f32 %v833_v11, %v717_v2  ;;  %v1083_v34 = vpop.f32.mrf.mxu0 }
 0x11d   :  { %v1100_v3 = vpop.f32.mrf.mxu1  ;;  %v747_v24 = vadd.f32 %v1083_v34, %v618_v4 }
 0x11e   :  { %890 = vst [vmem:[#allocation8 + $0x8] sm:$0xff] %v882_v19  ;;  %v881_v9 = vadd.f32 %v879_v12, %v834_v20  ;;  %v852_v15 = vadd.f32 %v1100_v3, %v735_v14  ;;  %v740_v18 = vpop.f32.mrf.mxu0 }
 0x11f   :  { %v845_v21 = vpop.f32.mrf.mxu1  ;;  %v741_v35 = vadd.f32 %v740_v18, %v610_v22 }
 0x120   :  { %889 = vst [vmem:[#allocation8] sm:$0xff] %v881_v9  ;;  %v884_v26 = vadd.f32 %v880_v63, %v852_v15  ;;  %v846_v27 = vadd.f32 %v845_v21, %v729_v5  ;;  %v1086_v32 = vpop.f32.mrf.mxu0 }
 0x121   :  { %v1103_v23 = vpop.f32.mrf.mxu1  ;;  %v759_v25 = vadd.f32 %v1086_v32, %v634_v28 }
 0x122   :  { %892 = vst [vmem:[#allocation8 + $0x18] sm:$0xff] %v884_v26  ;;  %v883_v36 = vadd.f32 %v879_v12, %v846_v27  ;;  %v864_v37 = vadd.f32 %v1103_v23, %v747_v24  ;;  %v752_v38 = vpop.f32.mrf.mxu0 }
 0x123   :  { %v857_v39 = vpop.f32.mrf.mxu1  ;;  %v753_v43 = vadd.f32 %v752_v38, %v626_v40 }
 0x124   :  { %891 = vst [vmem:[#allocation8 + $0x10] sm:$0xff] %v883_v36  ;;  %v886_v31 = vadd.f32 %v880_v63, %v864_v37  ;;  %v858_v41 = vadd.f32 %v857_v39, %v741_v35 }
 0x125   :  { %v1106_v42 = vpop.f32.mrf.mxu1 }
 0x126   :  { %894 = vst [vmem:[#allocation8 + $0x28] sm:$0xff] %v886_v31  ;;  %v885_v44 = vadd.f32 %v879_v12, %v858_v41  ;;  %v876_v46 = vadd.f32 %v1106_v42, %v759_v25 }
 0x127   :  { %v869_v45 = vpop.f32.mrf.mxu1 }
 0x128   :  { %893 = vst [vmem:[#allocation8 + $0x20] sm:$0xff] %v885_v44  ;;  %v888_v47 = vadd.f32 %v880_v63, %v876_v46  ;;  %v870_v48 = vadd.f32 %v869_v45, %v753_v43 }
 0x12a   :  { %896 = vst [vmem:[#allocation8 + $0x38] sm:$0xff] %v888_v47  ;;  %v887_v49 = vadd.f32 %v879_v12, %v870_v48 }
 0x12c   :  { %895 = vst [vmem:[#allocation8 + $0x30] sm:$0xff] %v887_v49 }
 0x12d   :  { %1184 = shalt.err (!%p1181_p5)
}
 0x12e   :  { %908 = dma.vmem_to_hbm [thread:$0]  %s903_s2, 1024, %s1448_s3, [#allocation4], %s1201_s17, %s1201_s17, %s1202_s18  }
 0x12f   :  { %1197 = dma.done.wait [#allocation4], 1024  }
 0x130   :  { %1198 = vsyncadd [#allocation4], 4294966272 }
 0x131   :  { %912 = vsyncpa [#allocation3], 1 }
 0x132   :  { %913 = vsyncpa [#allocation6], 1 }
 0x133   :  { %914 = vsyncpa [#allocation4], 1 }

</bundles_post_ra>
